<compile_context>
chip_gen: v7x
topology: tpu7x:2x2x1
jax: 0.10.0
libtpu: 0.0.40
codegen_flags: <defaults>
</compile_context>

<pallas_src>
import jax
import jax.numpy as jnp
from jax.experimental import pallas as pl
from jax.experimental.pallas import tpu as pltpu

IN_FEATURES = 40
FOLD = 16                        # rows folded into one lane-dense VMEM row
FOLDED_K = FOLD * IN_FEATURES    # 640 = 5 * 128 lanes -> fully dense tiles


def linear_kernel(x_ref, w_ref, b_ref, o_ref):
    # x_ref: (tm16, 640) VMEM     w_ref: (640, 16) VMEM (resident)
    # b_ref: (1,)       SMEM      o_ref: (tm16, 16) VMEM
    y = jnp.dot(x_ref[...], w_ref[...], preferred_element_type=jnp.float32)
    o_ref[...] = (y + b_ref[0]).astype(o_ref.dtype)


def linear_forward(x, weight, bias, *, tile_rows=65536):
    """Pallas equivalent of: x.view(-1, 40) @ weight.T + bias.

    weight: (1, 40), bias: (1,). `tile_rows` is the per-grid-step tile size in
    original (M, 40) rows; default 65536 (= 4096 folded rows, ~25 MiB of
    double-buffered VMEM) sits comfortably under v7x's 64 MiB VMEM while
    amortizing per-step pipeline overhead on all generations.
    """
    x2d = x.reshape(-1, IN_FEATURES)
    m = x2d.shape[0]
    dtype = x2d.dtype

    # Fold 16 rows per lane-dense row. Pad M up to a multiple of 16 if needed
    # (padded rows produce bias-only values and are sliced off afterwards).
    m_pad = pl.cdiv(m, FOLD) * FOLD
    if m_pad != m:
        x2d = jnp.pad(x2d, ((0, m_pad - m), (0, 0)))
    xf = x2d.reshape(m_pad // FOLD, FOLDED_K)      # free, row-major collapse
    m16 = xf.shape[0]

    # Block-diagonal expanded weight: W_exp[40*j + k, j] = w[k].
    w_exp = (jnp.eye(FOLD, dtype=weight.dtype)[:, None, :]
             * weight[0][None, :, None]).reshape(FOLDED_K, FOLD)
    bias1 = bias.reshape(1)

    # Tile size in folded rows; cap so the grid has >= 2 steps whenever there
    # is enough work (engages v7x's second TensorCore; no-op on v5e/v6e), and
    # keep the sublane dim a multiple of 8 unless it equals the full dim.
    tm16 = min(max(tile_rows // FOLD, 8), m16)
    if m16 >= 16:
        tm16 = min(tm16, -(-m16 // 2))
    if tm16 < m16:
        tm16 = -(-tm16 // 8) * 8
        if tm16 > m16:
            tm16 = m16
    grid_m = pl.cdiv(m16, tm16)

    out16 = pl.pallas_call(
        linear_kernel,
        out_shape=jax.ShapeDtypeStruct((m16, FOLD), dtype),
        grid_spec=pltpu.PrefetchScalarGridSpec(
            num_scalar_prefetch=0,
            grid=(grid_m,),
            in_specs=[
                # Activations: lane-dense (tm16, 640) tiles streamed over M.
                pl.BlockSpec((tm16, FOLDED_K), lambda i: (i, 0)),
                # Expanded weight: constant index_map -> resident in VMEM.
                pl.BlockSpec((FOLDED_K, FOLD), lambda i: (0, 0)),
                # Bias: single scalar kept in SMEM (no padded VMEM tile).
                pl.BlockSpec(memory_space=pltpu.MemorySpace.SMEM),
            ],
            out_specs=pl.BlockSpec((tm16, FOLD), lambda i: (i, 0)),
        ),
        compiler_params=pltpu.CompilerParams(
            # M tiles are independent -> both TensorCores may split them.
            dimension_semantics=("parallel",),
            # Explicit budget: ~25 MiB needed at default tile; 48 MiB leaves
            # headroom under v7x's 64 MiB and is far under v5e/v6e's 128 MiB.
            vmem_limit_bytes=48 * 1024 * 1024,
        ),
        cost_estimate=pl.CostEstimate(
            flops=2 * m_pad * IN_FEATURES,
            transcendentals=0,
            bytes_accessed=(m_pad * IN_FEATURES * 4          # activations in
                            + m16 * FOLD * 4                 # outputs out
                            + FOLDED_K * FOLD * 4 + 4),      # weight + bias
        ),
    )(xf, w_exp, bias1)

    # (m16, 16) -> (m_pad, 1) in the original row order, drop any padding.
    out = out16.reshape(m_pad, 1)
    if m_pad != m:
        out = out[:m]
    return out


if __name__ == "__main__":
    key = jax.random.PRNGKey(0)
    k_x, k_w, k_b, k_x2 = jax.random.split(key, 4)

    # Deterministic parameters (nn.Linear(40, 1) shapes: W (1, 40), b (1,)).
    bound = 1.0 / jnp.sqrt(float(IN_FEATURES))
    weight = jax.random.uniform(k_w, (1, IN_FEATURES), jnp.float32, -bound, bound)
    bias = jax.random.uniform(k_b, (1,), jnp.float32, -bound, bound)

    # Small example input: (2, 4, 40) -> view(-1, 40) -> (8, 40).
    # Exercises the M % 16 != 0 padding path.
    x = jax.random.normal(k_x, (2, 4, IN_FEATURES), jnp.float32)
    out = jax.block_until_ready(linear_forward(x, weight, bias))
    ref = x.reshape(-1, IN_FEATURES) @ weight.T + bias
    assert out.shape == (8, 1)
    assert jnp.allclose(out, ref, atol=1e-5), "mismatch vs reference (small)"

    # Larger input divisible by 16 -> pure folded path, 2 grid steps with a
    # partial last block (520 folded rows -> tiles of 264 + 256).
    x_big = jax.random.normal(k_x2, (8320, IN_FEATURES), jnp.float32)
    out_big = jax.block_until_ready(linear_forward(x_big, weight, bias))
    ref_big = x_big @ weight.T + bias
    assert out_big.shape == (8320, 1)
    assert jnp.allclose(out_big, ref_big, atol=1e-4), "mismatch vs reference (tiled)"

    print("KERNEL_OK")
</pallas_src>

<mosaic_0001>
module attributes {stable_mosaic.version = 11 : i64} {
  func.func @linear_kernel(%arg0: i32, %arg1: memref<1x640xf32, #tpu.memory_space<vmem>>, %arg2: memref<640x16xf32, #tpu.memory_space<vmem>>, %arg3: memref<1xf32, #tpu.memory_space<smem>>, %arg4: memref<1x16xf32, #tpu.memory_space<vmem>>) attributes {dimension_semantics = [#tpu.dimension_semantics<parallel>], iteration_bounds = array<i64: 1>, scalar_prefetch = 0 : i64, scratch_operands = 0 : i64, tpu.core_type = #tpu.core_type<tc>, window_params = [{transform_indices = @transform_0, window_bounds = array<i64: 1, 640>}, {pipeline_mode = #tpu.pipeline_mode<synchronous>, transform_indices = @transform_1, window_bounds = array<i64: 640, 16>}, {transform_indices = @transform_2, window_bounds = array<i64: 1>}, {transform_indices = @transform_3, window_bounds = array<i64: 1, 16>}]} {
    %c0 = arith.constant 0 : index
    %c0_0 = arith.constant 0 : index
    %0 = vector.load %arg1[%c0, %c0_0] : memref<1x640xf32, #tpu.memory_space<vmem>>, vector<1x640xf32>
    %c0_1 = arith.constant 0 : index
    %c0_2 = arith.constant 0 : index
    %1 = vector.load %arg2[%c0_1, %c0_2] : memref<640x16xf32, #tpu.memory_space<vmem>>, vector<640x16xf32>
    %cst = arith.constant dense<0.000000e+00> : vector<1x16xf32>
    %2 = tpu.matmul %0, %1, %cst {dimension_numbers = #tpu.dot_dimension_numbers<[1], [0], [0], [1], [0, 0, 1, 1], [], []>} : vector<1x640xf32>, vector<640x16xf32>, vector<1x16xf32> -> vector<1x16xf32>
    %c0_3 = arith.constant 0 : index
    %3 = memref.load %arg3[%c0_3] : memref<1xf32, #tpu.memory_space<smem>>
    %4 = vector.broadcast %3 : f32 to vector<1x16xf32>
    %5 = arith.addf %2, %4 : vector<1x16xf32>
    %c0_4 = arith.constant 0 : index
    %c0_5 = arith.constant 0 : index
    %6 = vector.load %arg4[%c0_4, %c0_5] : memref<1x16xf32, #tpu.memory_space<vmem>>, vector<1x16xf32>
    tpu.vector_store %arg4[%c0_4, %c0_5], %5 {strides = array<i32>} : memref<1x16xf32, #tpu.memory_space<vmem>>, vector<1x16xf32>,
    return
  }
  func.func @transform_0(%arg0: i32) -> (i32, i32) {
    %c0_i32 = arith.constant 0 : i32
    %c0_i32_0 = arith.constant 0 : i32
    return %arg0, %c0_i32 : i32, i32
  }
  func.func @transform_1(%arg0: i32) -> (i32, i32) {
    %c0_i32 = arith.constant 0 : i32
    %c0_i32_0 = arith.constant 0 : i32
    %c0_i32_1 = arith.constant 0 : i32
    return %c0_i32, %c0_i32_0 : i32, i32
  }
  func.func @transform_2(%arg0: i32) -> i32 {
    %c0_i32 = arith.constant 0 : i32
    %c0_i32_0 = arith.constant 0 : i32
    return %c0_i32 : i32
  }
  func.func @transform_3(%arg0: i32) -> (i32, i32) {
    %c0_i32 = arith.constant 0 : i32
    %c0_i32_0 = arith.constant 0 : i32
    return %arg0, %c0_i32 : i32, i32
  }
}

</mosaic_0001>

<bundles_post_ra>
// kernel: tpu_custom_call.1
= control target key start
LH: loop header
LB: loop body
LE: loop exit
PB: predicated region body
PF: predicated region fallthrough
CT: control target
= control target key end

     0   :  { %v100_v43 = vlaneseq  ;;  %s885_s0 = inlined_call_operand.vmem [shape: f32[1,640], index: 0, kind: input, shape index: {}]   ;;  %s886_s1 = inlined_call_operand.vmem [shape: f32[640,16], index: 1, kind: input, shape index: {}]   ;;  %s887_s2 = inlined_call_operand.<no memory space> [shape: f32[1], index: 2, kind: input, shape index: {}]   ;;  %s888_s3 = inlined_call_operand.hbm [shape: f32[1,16], index: 3, kind: output, shape index: {}]  }
   0x1   :  { %v33_v0 = vld [vmem:[%s886_s1 + $0x80] sm:$0xff]  ;;  %v34_v1 = vld [vmem:[%s886_s1 + $0x88] sm:$0xff]  ;;  %v35_v11 = vld [vmem:[%s886_s1 + $0x90] sm:$0xff] }
   0x2   :  { %v17_v2 = vld [vmem:[%s886_s1] sm:$0xff]  ;;  %v473_v3 = vpack.c.bf16 %v34_v1, %v33_v0  ;;  %v18_v4 = vld [vmem:[%s886_s1 + $0x8] sm:$0xff]  ;;  %v36_v13 = vld [vmem:[%s886_s1 + $0x98] sm:$0xff]  ;;  %v730_v57 = vshrl.u32 %v100_v43, 7 }
   0x3   :  { %v65_v5 = vld [vmem:[%s886_s1 + $0x180] sm:$0xff]  ;;  %v66_v6 = vld [vmem:[%s886_s1 + $0x188] sm:$0xff]  ;;  %v475_v7 = vpack.c.bf16 %v18_v4, %v17_v2  ;;  %v19_v14 = vld [vmem:[%s886_s1 + $0x10] sm:$0xff]  ;;  %v477_v16 = vpack.c.bf16 %v36_v13, %v35_v11 }
   0x4   :  { %v505_v8 = vpack.c.bf16 %v66_v6, %v65_v5  ;;  %v49_v9 = vld [vmem:[%s886_s1 + $0x100] sm:$0xff]  ;;  %v50_v10 = vld [vmem:[%s886_s1 + $0x108] sm:$0xff]  ;;  %474 = vmatprep.subr.bf16.mxu0 %v473_v3  ;;  %v20_v15 = vld [vmem:[%s886_s1 + $0x18] sm:$0xff]  ;;  %v106_v6 = vsub.s32 1, %v730_v57  ;;  %v114_v11 = vsub.s32 3, %v730_v57 }
   0x5   :  { %v507_v12 = vpack.c.bf16 %v50_v10, %v49_v9  ;;  %476 = vmatpush3.bf16.msra.mxu0 %v475_v7  ;;  %v479_v17 = vpack.c.bf16 %v20_v15, %v19_v14  ;;  %v67_v18 = vld [vmem:[%s886_s1 + $0x190] sm:$0xff]  ;;  %v68_v19 = vld [vmem:[%s886_s1 + $0x198] sm:$0xff]  ;;  %v37_v23 = vld [vmem:[%s886_s1 + $0xa0] sm:$0xff] }
   0x6   :  { %506 = vmatprep.subr.bf16.mxu1 %v505_v8  ;;  %v51_v20 = vld [vmem:[%s886_s1 + $0x110] sm:$0xff]  ;;  %v509_v21 = vpack.c.bf16 %v68_v19, %v67_v18  ;;  %v52_v22 = vld [vmem:[%s886_s1 + $0x118] sm:$0xff]  ;;  %v38_v24 = vld [vmem:[%s886_s1 + $0xa8] sm:$0xff]  ;;  %478 = vmatprep.subr.bf16.mxu0 %v477_v16 }
   0x7   :  { %508 = vmatpush3.bf16.msra.mxu1 %v507_v12  ;;  %v511_v25 = vpack.c.bf16 %v52_v22, %v51_v20  ;;  %v481_v26 = vpack.c.bf16 %v38_v24, %v37_v23  ;;  %v21_v27 = vld [vmem:[%s886_s1 + $0x20] sm:$0xff]  ;;  %v22_v28 = vld [vmem:[%s886_s1 + $0x28] sm:$0xff]  ;;  %v39_v35 = vld [vmem:[%s886_s1 + $0xb0] sm:$0xff] }
   0x8   :  { %v69_v29 = vld [vmem:[%s886_s1 + $0x1a0] sm:$0xff]  ;;  %510 = vmatprep.subr.bf16.mxu1 %v509_v21  ;;  %v70_v30 = vld [vmem:[%s886_s1 + $0x1a8] sm:$0xff]  ;;  %v483_v33 = vpack.c.bf16 %v22_v28, %v21_v27  ;;  %v40_v36 = vld [vmem:[%s886_s1 + $0xb8] sm:$0xff] }
   0x9   :  { %v53_v31 = vld [vmem:[%s886_s1 + $0x120] sm:$0xff]  ;;  %v54_v32 = vld [vmem:[%s886_s1 + $0x128] sm:$0xff]  ;;  %480 = vmatpush3.bf16.msra.mxu0 %v479_v17  ;;  %v513_v34 = vpack.c.bf16 %v70_v30, %v69_v29  ;;  %v23_v37 = vld [vmem:[%s886_s1 + $0x30] sm:$0xff]  ;;  %v485_v39 = vpack.c.bf16 %v40_v36, %v39_v35 }
   0xa   :  { %482 = vmatprep.subr.bf16.mxu0 %v481_v26  ;;  %v515_v38 = vpack.c.bf16 %v54_v32, %v53_v31  ;;  %v24_v40 = vld [vmem:[%s886_s1 + $0x38] sm:$0xff]  ;;  %v71_v41 = vld [vmem:[%s886_s1 + $0x1b0] sm:$0xff]  ;;  %v41_v47 = vld [vmem:[%s886_s1 + $0xc0] sm:$0xff] }
   0xb   :  { %512 = vmatpush3.bf16.msra.mxu1 %v511_v25  ;;  %v72_v42 = vld [vmem:[%s886_s1 + $0x1b8] sm:$0xff]  ;;  %v55_v45 = vld [vmem:[%s886_s1 + $0x130] sm:$0xff]  ;;  %v42_v48 = vld [vmem:[%s886_s1 + $0xc8] sm:$0xff]  ;;  %v487_v49 = vpack.c.bf16 %v24_v40, %v23_v37  ;;  %v102_v37 = vsub.s32 0, %v730_v57 }
   0xc   :  { %514 = vmatprep.subr.bf16.mxu1 %v513_v34  ;;  %v517_v44 = vpack.c.bf16 %v72_v42, %v71_v41  ;;  %v56_v46 = vld [vmem:[%s886_s1 + $0x138] sm:$0xff]  ;;  %v73_v50 = vld [vmem:[%s886_s1 + $0x1c0] sm:$0xff]  ;;  %v74_v51 = vld [vmem:[%s886_s1 + $0x1c8] sm:$0xff]  ;;  %v489_v53 = vpack.c.bf16 %v42_v48, %v41_v47 }
   0xd   :  { %484 = vmatpush3.bf16.msra.mxu0 %v483_v33  ;;  %v519_v52 = vpack.c.bf16 %v56_v46, %v55_v45  ;;  %v25_v54 = vld [vmem:[%s886_s1 + $0x40] sm:$0xff]  ;;  %v26_v55 = vld [vmem:[%s886_s1 + $0x48] sm:$0xff]  ;;  %v521_v58 = vpack.c.bf16 %v74_v51, %v73_v50  ;;  %v43_v60 = vld [vmem:[%s886_s1 + $0xd0] sm:$0xff] }
   0xe   :  { %486 = vmatprep.subr.bf16.mxu0 %v485_v39  ;;  %v57_v56 = vld [vmem:[%s886_s1 + $0x140] sm:$0xff]  ;;  %v58_v59 = vld [vmem:[%s886_s1 + $0x148] sm:$0xff]  ;;  %v44_v61 = vld [vmem:[%s886_s1 + $0xd8] sm:$0xff]  ;;  %v491_v0 = vpack.c.bf16 %v26_v55, %v25_v54 }
   0xf   :  { %516 = vmatpush3.bf16.msra.mxu1 %v515_v38  ;;  %v75_v62 = vld [vmem:[%s886_s1 + $0x1d0] sm:$0xff]  ;;  %v76_v63 = vld [vmem:[%s886_s1 + $0x1d8] sm:$0xff]  ;;  %v523_v1 = vpack.c.bf16 %v58_v59, %v57_v56  ;;  %v493_v2 = vpack.c.bf16 %v44_v61, %v43_v60  ;;  %v45_v9 = vld [vmem:[%s886_s1 + $0xe0] sm:$0xff] }
  0x10   :  { %518 = vmatprep.subr.bf16.mxu1 %v517_v44  ;;  %v27_v3 = vld [vmem:[%s886_s1 + $0x50] sm:$0xff]  ;;  %v28_v4 = vld [vmem:[%s886_s1 + $0x58] sm:$0xff]  ;;  %v525_v7 = vpack.c.bf16 %v76_v63, %v75_v62  ;;  %v46_v10 = vld [vmem:[%s886_s1 + $0xe8] sm:$0xff] }
  0x11   :  { %488 = vmatpush3.bf16.msra.mxu0 %v487_v49  ;;  %v59_v5 = vld [vmem:[%s886_s1 + $0x150] sm:$0xff]  ;;  %v60_v8 = vld [vmem:[%s886_s1 + $0x158] sm:$0xff]  ;;  %v77_v12 = vld [vmem:[%s886_s1 + $0x1e0] sm:$0xff]  ;;  %v495_v14 = vpack.c.bf16 %v28_v4, %v27_v3  ;;  %v497_v17 = vpack.c.bf16 %v46_v10, %v45_v9 }
  0x12   :  { %490 = vmatprep.subr.bf16.mxu0 %v489_v53  ;;  %v78_v13 = vld [vmem:[%s886_s1 + $0x1e8] sm:$0xff]  ;;  %v776_v15 = vld [vmem:[%s885_s0] sm:$0x1f]  ;;  %v527_v16 = vpack.c.bf16 %v60_v8, %v59_v5  ;;  %v47_v24 = vld [vmem:[%s886_s1 + $0xf0] sm:$0xff] }
  0x13   :  { %520 = vmatpush3.bf16.msra.mxu1 %v519_v52  ;;  %v29_v18 = vld [vmem:[%s886_s1 + $0x60] sm:$0xff]  ;;  %v30_v19 = vld [vmem:[%s886_s1 + $0x68] sm:$0xff]  ;;  %v107_v21 = vrot.slane %v776_v15, %v106_v6  ;;  %v529_v22 = vpack.c.bf16 %v78_v13, %v77_v12  ;;  %v48_v25 = vld [vmem:[%s886_s1 + $0xf8] sm:$0xff]  ;;  %v115_v26 = vrot.slane %v776_v15, %v114_v11 }
  0x14   :  { %522 = vmatprep.subr.bf16.mxu1 %v521_v58  ;;  %v61_v20 = vld [vmem:[%s886_s1 + $0x160] sm:$0xff]  ;;  %v62_v23 = vld [vmem:[%s886_s1 + $0x168] sm:$0xff]  ;;  %v79_v27 = vld [vmem:[%s886_s1 + $0x1f0] sm:$0xff]  ;;  %v499_v29 = vpack.c.bf16 %v30_v19, %v29_v18  ;;  %v501_v31 = vpack.c.bf16 %v48_v25, %v47_v24 }
  0x15   :  { %492 = vmatpush3.bf16.msra.mxu0 %v491_v0  ;;  %v80_v28 = vld [vmem:[%s886_s1 + $0x1f8] sm:$0xff]  ;;  %189 = vmatprep.mubr.f32.mxu0 %v107_v21  ;;  %v531_v30 = vpack.c.bf16 %v62_v23, %v61_v20  ;;  %v31_v32 = vld [vmem:[%s886_s1 + $0x70] sm:$0xff] }
  0x16   :  { %494 = vmatprep.subr.bf16.mxu0 %v493_v2  ;;  %259 = vmatprep.mubr.f32.mxu1 %v115_v26  ;;  %v32_v33 = vld [vmem:[%s886_s1 + $0x78] sm:$0xff]  ;;  %v533_v34 = vpack.c.bf16 %v80_v28, %v79_v27  ;;  %v63_v35 = vld [vmem:[%s886_s1 + $0x170] sm:$0xff] }
  0x17   :  { %524 = vmatpush3.bf16.msra.mxu1 %v523_v1  ;;  %v64_v36 = vld [vmem:[%s886_s1 + $0x178] sm:$0xff] }
  0x18   :  { %526 = vmatprep.subr.bf16.mxu1 %v525_v7 }
  0x19   :  { %496 = vmatpush3.bf16.msra.mxu0 %v495_v14 }
  0x1a   :  { %498 = vmatprep.subr.bf16.mxu0 %v497_v17 }
  0x1b   :  { %528 = vmatpush3.bf16.msra.mxu1 %v527_v16 }
  0x1c   :  { %530 = vmatprep.subr.bf16.mxu1 %v529_v22 }
  0x1d   :  { %9 = vsyncpa [#allocation4], 0  ;;  %500 = vmatpush3.bf16.msra.mxu0 %v499_v29  ;;  %v503_v38 = vpack.c.bf16 %v32_v33, %v31_v32  ;;  %v110_v39 = vsub.s32 2, %v730_v57  ;;  %v535_v40 = vpack.c.bf16 %v64_v36, %v63_v35  ;;  %v81_v41 = vld [vmem:[%s886_s1 + $0x200] sm:$0xff]  ;;  %v82_v42 = vld [vmem:[%s886_s1 + $0x208] sm:$0xff]  ;;  %v103_v43 = vrot.slane %v776_v15, %v102_v37 }
  0x1e   :  { %502 = vmatprep.subr.bf16.mxu0 %v501_v31  ;;  %v538_v44 = vpack.c.bf16 %v82_v42, %v81_v41  ;;  %v589_v46 = vmov 0.0|0.0   ;;  %v83_v47 = vld [vmem:[%s886_s1 + $0x210] sm:$0xff]  ;;  %v84_v48 = vld [vmem:[%s886_s1 + $0x218] sm:$0xff]  ;;  %v85_v50 = vld [vmem:[%s886_s1 + $0x220] sm:$0xff]  ;;  %vm590_vm0 = vmmov 0   ;;  %v591_v52 = vmov 0.0  }
  0x1f   :  { %532 = vmatpush3.bf16.msra.mxu1 %v531_v30  ;;  %v111_v45 = vrot.slane %v776_v15, %v110_v39  ;;  %v541_v49 = vpack.c.bf16 %v84_v48, %v83_v47  ;;  %v86_v51 = vld [vmem:[%s886_s1 + $0x228] sm:$0xff]  ;;  %v87_v54 = vld [vmem:[%s886_s1 + $0x230] sm:$0xff]  ;;  %v88_v55 = vld [vmem:[%s886_s1 + $0x238] sm:$0xff]  ;;  %v118_v5 = vsub.s32 4, %v730_v57  ;;  %v98_v9 = vstv %s887_s2 }
  0x20   :  { %534 = vmatprep.subr.bf16.mxu1 %v533_v34  ;;  %v544_v53 = vpack.c.bf16 %v86_v51, %v85_v50  ;;  %v547_v56 = vpack.c.bf16 %v88_v55, %v87_v54  ;;  %v89_v58 = vld [vmem:[%s886_s1 + $0x240] sm:$0xff]  ;;  %v90_v59 = vld [vmem:[%s886_s1 + $0x248] sm:$0xff]  ;;  %v91_v61 = vld [vmem:[%s886_s1 + $0x250] sm:$0xff]  ;;  %vm335_vm1 = vcmask 122880  }
  0x21   :  { %504 = vmatpush3.bf16.msra.mxu0 %v503_v38  ;;  %v550_v60 = vpack.c.bf16 %v90_v59, %v89_v58  ;;  %v92_v62 = vld [vmem:[%s886_s1 + $0x258] sm:$0xff]  ;;  %v93_v0 = vld [vmem:[%s886_s1 + $0x260] sm:$0xff]  ;;  %v94_v1 = vld [vmem:[%s886_s1 + $0x268] sm:$0xff]  ;;  %v119_v7 = vrot.slane %v776_v15, %v118_v5 }
  0x22   :  { %537 = vmatprep.subr.bf16.mxu0 %v589_v46  ;;  %v553_v63 = vpack.c.bf16 %v92_v62, %v91_v61  ;;  %v556_v2 = vpack.c.bf16 %v94_v1, %v93_v0  ;;  %v95_v3 = vld [vmem:[%s886_s1 + $0x270] sm:$0xff]  ;;  %v96_v4 = vld [vmem:[%s886_s1 + $0x278] sm:$0xff]  ;;  %s592_s1 = smov [#allocation3]  }
  0x23   :  { %536 = vmatpush3.bf16.msra.mxu1 %v535_v40  ;;  %v559_v6 = vpack.c.bf16 %v96_v4, %v95_v3  ;;  %s343_s12 = sshll.u32 %s592_s1, 4  ;;  %s344_s12 = int_to_ptr.vmem [resolvable:$true] %s343_s12 }
  0x24   :  { %190 = vmatmul.mubr.f32.vlgmr.msra.gmra.mrb[0].mxu0 %v103_v43  ;;  %s565_s13 = scalar_lea.vmem %s344_s12, 16  ;;  %s569_s14 = scalar_lea.vmem %s344_s12, 32 }
  0x25   :  { %539 = vmatpush3.bf16.msra.mxu0 %v538_v44  ;;  %470 = vmatprep.mubr.msk.f32.mxu0 %vm590_vm0, %v591_v52  ;;  %p566_p0 = scmp.ne.s32.totalorder %s344_s12, %s565_s13  ;;  %p570_p1 = scmp.lt.s32.totalorder %s344_s12, %s344_s12 }
  0x26   :  { %260 = vmatmul.mubr.f32.vlgmr.msra.gmra.mrb[0].mxu1 %v111_v45  ;;  %540 = vmatprep.subr.bf16.mxu0 %v589_v46  ;;  %p571_p2 = scmp.lt.s32.totalorder %s569_s14, %s565_s13 }
  0x28   :  { %p572_p3 = por %p571_p2, %p570_p1 }
  0x29   :  { %542 = vmatpush3.bf16.msra.mxu0 %v541_v49 }
  0x2a   :  { %543 = vmatprep.subr.bf16.mxu0 %v589_v46  ;;  %p573_p4 = pnand %p572_p3, %p566_p0 }
  0x2d   :  { %545 = vmatpush3.bf16.msra.mxu0 %v544_v53 }
  0x2e   :  { %546 = vmatprep.subr.bf16.mxu0 %v589_v46 }
  0x31   :  { %548 = vmatpush3.bf16.msra.mxu0 %v547_v56 }
  0x32   :  { %549 = vmatprep.subr.bf16.mxu0 %v589_v46 }
  0x35   :  { %551 = vmatpush3.bf16.msra.mxu0 %v550_v60 }
  0x36   :  { %552 = vmatprep.subr.bf16.mxu0 %v589_v46 }
  0x39   :  { %554 = vmatpush3.bf16.msra.mxu0 %v553_v63 }
  0x3a   :  { %555 = vmatprep.subr.bf16.mxu0 %v589_v46 }
  0x3d   :  { %557 = vmatpush3.bf16.msra.mxu0 %v556_v2 }
  0x3e   :  { %558 = vmatprep.subr.bf16.mxu0 %v589_v46 }
  0x41   :  { %560 = vmatpush3.bf16.msra.mxu0 %v559_v6 }
  0x44   :  { %471 = vmatmul.mubr.f32.vlgmr.msra.gmra.mrb[2].mxu0 %v119_v7 }
  0xf7   :  { %v383_v8 = vpop.f32.mrb[0].mxu0 }
  0xf8   :  { %v384_v10 = vpop.f32.mrb[1].mxu0 }
  0xf9   :  { %v418_v11 = vpop.f32.mrb[0].mxu1  ;;  %v385_v12 = vadd.f32 %v384_v10, %v383_v8 }
  0xfa   :  { %v419_v13 = vpop.f32.mrb[1].mxu1 }
  0xfb   :  { %v420_v14 = vadd.f32 %v419_v13, %v418_v11  ;;  %v192_v16 = vadd.f32 %v385_v12, %v98_v9 }
  0xfd   :  { %v262_v17 = vadd.f32 %v420_v14, %v192_v16 }
 0x117   :  { %v331_v57 = vpop.f32.mrb[2].mxu0 }
 0x118   :  { %v332_v18 = vadd.f32 %v331_v57, %v262_v17  ;;  %v472_v15 = vpop.f32.mrb[3].mxu0 }
 0x11a   :  { %336 = vst.msk [vmem:[#allocation3] sm:$0x1] %vm335_vm1, %v332_v18 }
 0x11b   :  { %576 = shalt.err (!%p573_p4)
}
 0x11c   :  { %s577_s0 = scalar_lea.hbm %s888_s3, 16 }
 0x11d   :  { %p578_p5 = scmp.ne.s32.totalorder %s888_s3, %s577_s0  ;;  %p581_p6 = scmp.lt.u32.totalorder %s577_s0, %s888_s3 }
 0x11f   :  { %p583_p7 = pnand %p581_p6, %p578_p5 }
 0x121   :  { %586 = shalt.err (!%p583_p7)
}
 0x122   :  { %346 = dma.vmem_to_hbm [thread:$0]  %s344_s12, 16, %s888_s3, [#allocation4]  }
 0x123   :  { %587 = dma.done.wait [#allocation4], 16  }
 0x124   :  { %588 = vsyncadd [#allocation4], 4294967280 }
 0x125   :  { %350 = vsyncpa [#allocation4], 1 }

</bundles_post_ra>
